<compile_context>
chip_gen: v5e
topology: v5e:2x2
jax: 0.10.0
libtpu: 0.0.40
codegen_flags: <defaults>
</compile_context>

<pallas_src>
import jax
import jax.numpy as jnp
from jax import lax
from jax.experimental import pallas as pl
from jax.experimental.pallas import tpu as pltpu


def _vmem_capacity_bytes():
    """Physical per-core VMEM; conservative 64 MiB fallback if the query fails."""
    try:
        return int(pltpu.get_tpu_info().vmem_capacity_bytes)
    except Exception:
        return 64 << 20


def _pick_seq_tile(seq_len, hidden, itemsize, max_block_bytes):
    """Largest sequence tile dividing seq_len (multiple of 8, or == seq_len) within budget."""
    for ts in range(min(seq_len, 512), 0, -1):
        if seq_len % ts:
            continue
        if ts % 8 and ts != seq_len:
            continue
        if ts * hidden * itemsize <= max_block_bytes:
            return ts
    # Nothing fits the budget: fall back to the smallest legal tile (correctness first).
    for ts in range(8, seq_len + 1, 8):
        if seq_len % ts == 0:
            return ts
    return seq_len


def _make_kernel(has_mask, use_mxu):
    def kernel(*refs):
        if has_mask:
            ids_ref, tok_ref, pos_ref, msk_ref, delta_ref, o_ref = refs
        else:
            ids_ref, tok_ref, pos_ref, o_ref = refs
            msk_ref = delta_ref = None

        ts = o_ref.shape[0]

        if use_mxu:
            # One-hot MXU gather: (TS, V) x (V, H) -> (TS, H) in f32.
            v = tok_ref.shape[0]
            onehot = (lax.broadcasted_iota(jnp.int32, (ts, v), 1)
                      == ids_ref[...]).astype(tok_ref.dtype)
            x = jnp.dot(onehot, tok_ref[...], preferred_element_type=jnp.float32)
        else:
            # Row-gather from the VMEM-resident table (large vocab), 8-way unrolled so the
            # LLO scheduler can overlap independent sublane loads/stores.
            def gather_row(r, carry):
                tok = ids_ref[0, r]
                o_ref[pl.ds(r, 1), :] = tok_ref[pl.ds(tok, 1), :]
                return carry

            lax.fori_loop(0, ts, gather_row, 0,
                          unroll=(8 if ts % 8 == 0 else True))
            x = o_ref[...].astype(jnp.float32)

        # Position add (mask base row already folded into pos in the wrapper) and the
        # mask delta select, all in f32, one fused store.
        x = x + pos_ref[...].astype(jnp.float32)
        if has_mask:
            x = x + msk_ref[...].astype(jnp.float32) * delta_ref[...].astype(jnp.float32)
        o_ref[...] = x.astype(o_ref.dtype)

    return kernel


def embedding_forward(input_ids, tok_table, pos_table, mask_table, mask=None,
                      *, gather_impl="auto"):
    """Equivalent of Embedding.forward(Input, mask). gather_impl in {auto, mxu, loop}."""
    B, S = input_ids.shape
    V, H = tok_table.shape
    dtype = tok_table.dtype
    itemsize = jnp.dtype(dtype).itemsize

    if S > pos_table.shape[0]:
        raise ValueError(
            f"seq_len {S} exceeds max_position_embeddings {pos_table.shape[0]}")

    # ---- chip-aware VMEM budgets -------------------------------------------------
    cap = _vmem_capacity_bytes()                       # per-core physical VMEM
    max_block_bytes = (2 << 20) if cap <= (64 << 20) else (4 << 20)
    headroom = 8 << 20
    # The constant-index table may still be double-buffered by the pipeline -> 2x account.
    table_budget = max(0, cap - headroom - 6 * max_block_bytes) // 2

    # ---- lane-dense hidden dim ---------------------------------------------------
    H_pad = max(128, -(-H // 128) * 128)
    pad_h = H_pad - H

    has_mask = mask is not None

    # ---- host-side prep (grid-invariant math hoisted out of the kernel) ----------
    pos_used = pos_table[:S].astype(jnp.float32)
    if has_mask:
        pos_used = pos_used + mask_table[0][None, :].astype(jnp.float32)
    pos_used = pos_used.astype(dtype)

    tok_used = tok_table
    if pad_h:
        tok_used = jnp.pad(tok_used, ((0, 0), (0, pad_h)))
        pos_used = jnp.pad(pos_used, ((0, 0), (0, pad_h)))

    table_bytes = V * H_pad * itemsize
    if table_bytes > table_budget:
        # TODO(synk): large-vocab path (manual double-buffered per-row async-copy gather
        # from HBM) is not implemented; only the VMEM-resident-table path is.
        raise NotImplementedError("token table too large for VMEM-resident kernel")

    TS = _pick_seq_tile(S, H_pad, itemsize, max_block_bytes)
    n_seq_tiles = S // TS

    use_mxu = (gather_impl == "mxu") or (gather_impl == "auto" and V <= 4096)

    # Clamp ids (PyTorch raises on OOB; here we avoid silent OOB VMEM reads).
    ids = jnp.clip(input_ids.astype(jnp.int32), 0, V - 1)

    in_specs = []
    args = []

    if use_mxu:
        # ids as a small (TS, 1) int32 VMEM block per tile -> drives the one-hot compare.
        in_specs.append(pl.BlockSpec((None, TS, 1), lambda s, b: (b, s, 0)))
        args.append(ids.reshape(B, S, 1))
    else:
        # ids as a per-tile SMEM block (a few KiB), scalar-indexed inside the kernel.
        in_specs.append(pl.BlockSpec((1, TS), lambda s, b: (b, s),
                                     memory_space=pltpu.MemorySpace.SMEM))
        args.append(ids)

    # Token table: full array, constant block index -> fetched into VMEM once.
    in_specs.append(pl.BlockSpec((V, H_pad), lambda s, b: (0, 0)))
    args.append(tok_used)

    # Position slab: block index constant across the inner batch axis -> re-DMA elided.
    in_specs.append(pl.BlockSpec((TS, H_pad), lambda s, b: (s, 0)))
    args.append(pos_used)

    if has_mask:
        mask_vals = mask.astype(dtype).reshape(B, S, 1)
        in_specs.append(pl.BlockSpec((None, TS, 1), lambda s, b: (b, s, 0)))
        args.append(mask_vals)

        delta = (mask_table[1].astype(jnp.float32)
                 - mask_table[0].astype(jnp.float32)).astype(dtype).reshape(1, H)
        if pad_h:
            delta = jnp.pad(delta, ((0, 0), (0, pad_h)))
        in_specs.append(pl.BlockSpec((1, H_pad), lambda s, b: (0, 0)))
        args.append(delta)

    out_spec = pl.BlockSpec((None, TS, H_pad), lambda s, b: (b, s, 0))

    blk_bytes = TS * H_pad * itemsize
    bytes_accessed = (table_bytes                       # token table (once)
                      + S * H_pad * itemsize            # position slab (once)
                      + B * S * H_pad * itemsize        # output writeback
                      + B * S * 4                       # ids
                      + ((B * S + H_pad) * itemsize if has_mask else 0))
    flops = (2 * B * S * V * H_pad if use_mxu else 0) + (3 if has_mask else 2) * B * S * H_pad
    cost = pl.CostEstimate(flops=int(flops), transcendentals=0,
                           bytes_accessed=int(bytes_accessed))

    vmem_limit = int(min(2 * table_bytes + 6 * blk_bytes + headroom, cap))

    out = pl.pallas_call(
        _make_kernel(has_mask, use_mxu),
        out_shape=jax.ShapeDtypeStruct((B, S, H_pad), dtype),
        grid=(n_seq_tiles, B),
        in_specs=in_specs,
        out_specs=out_spec,
        compiler_params=pltpu.CompilerParams(
            dimension_semantics=("parallel", "parallel"),
            vmem_limit_bytes=vmem_limit),
        cost_estimate=cost,
    )(*args)

    if pad_h:
        out = out[..., :H]
    return out


if __name__ == "__main__":
    # Small config consistent with the module's __init__
    vocab_size = 64
    hidden_size = 128
    max_position_embeddings = 32
    B, S = 2, 16

    key = jax.random.PRNGKey(0)
    k_tok, k_pos, k_msk, k_in, k_m = jax.random.split(key, 5)

    # Deterministic synthetic parameters (nn.Embedding weights)
    tok_table = 0.02 * jax.random.normal(k_tok, (vocab_size, hidden_size), jnp.float32)
    pos_table = 0.02 * jax.random.normal(k_pos, (max_position_embeddings, hidden_size),
                                         jnp.float32)
    mask_table = 0.02 * jax.random.normal(k_msk, (2, hidden_size), jnp.float32)

    input_ids = jax.random.randint(k_in, (B, S), 0, vocab_size, jnp.int32)
    mask = jax.random.randint(k_m, (B, S), 0, 2, jnp.int32)

    # Pure-JAX reference
    pos_ids = jnp.broadcast_to(jnp.arange(S, dtype=jnp.int32)[None, :], (B, S))
    ref_no_mask = tok_table[input_ids] + pos_table[pos_ids]
    ref_with_mask = ref_no_mask + mask_table[mask]

    # 1) MXU one-hot path, with and without mask (auto picks MXU for V=64)
    out_with_mask = jax.block_until_ready(
        embedding_forward(input_ids, tok_table, pos_table, mask_table, mask))
    out_no_mask = jax.block_until_ready(
        embedding_forward(input_ids, tok_table, pos_table, mask_table, None))
    assert out_with_mask.shape == (B, S, hidden_size)
    assert jnp.allclose(out_no_mask, ref_no_mask, atol=1e-6), "no-mask (mxu) mismatch"
    assert jnp.allclose(out_with_mask, ref_with_mask, atol=1e-6), "mask (mxu) mismatch"

    # 2) Force the large-vocab row-gather path to make sure it compiles/runs too
    out_loop = jax.block_until_ready(
        embedding_forward(input_ids, tok_table, pos_table, mask_table, mask,
                          gather_impl="loop"))
    assert jnp.allclose(out_loop, ref_with_mask, atol=1e-6), "mask (loop) mismatch"

    # 3) Non-128-multiple hidden dim exercises the lane-padding path
    H2 = 96
    tok2 = tok_table[:, :H2]
    pos2 = pos_table[:, :H2]
    msk2 = mask_table[:, :H2]
    out_pad = jax.block_until_ready(
        embedding_forward(input_ids, tok2, pos2, msk2, mask))
    ref_pad = tok2[input_ids] + pos2[pos_ids] + msk2[mask]
    assert out_pad.shape == (B, S, H2)
    assert jnp.allclose(out_pad, ref_pad, atol=1e-6), "padded-H mismatch"

    print("KERNEL_OK")
</pallas_src>

<mosaic_0001>
module attributes {stable_mosaic.version = 11 : i64} {
  func.func @kernel(%arg0: i32, %arg1: i32, %arg2: memref<1x16x1xi32, #tpu.memory_space<vmem>>, %arg3: memref<64x128xf32, #tpu.memory_space<vmem>>, %arg4: memref<16x128xf32, #tpu.memory_space<vmem>>, %arg5: memref<1x16x1xf32, #tpu.memory_space<vmem>>, %arg6: memref<1x128xf32, #tpu.memory_space<vmem>>, %arg7: memref<1x16x128xf32, #tpu.memory_space<vmem>>) attributes {dimension_semantics = [#tpu.dimension_semantics<parallel>, #tpu.dimension_semantics<parallel>], iteration_bounds = array<i64: 1, 2>, scalar_prefetch = 0 : i64, scratch_operands = 0 : i64, tpu.core_type = #tpu.core_type<tc>, window_params = [{transform_indices = @transform_0, window_bounds = array<i64: 1, 16, 1>}, {pipeline_mode = #tpu.pipeline_mode<synchronous>, transform_indices = @transform_1, window_bounds = array<i64: 64, 128>}, {transform_indices = @transform_2, window_bounds = array<i64: 16, 128>}, {transform_indices = @transform_3, window_bounds = array<i64: 1, 16, 1>}, {pipeline_mode = #tpu.pipeline_mode<synchronous>, transform_indices = @transform_4, window_bounds = array<i64: 1, 128>}, {transform_indices = @transform_5, window_bounds = array<i64: 1, 16, 128>}]} {
    %0 = tpu.iota {dimensions = array<i32: 1>} : vector<16x64xi32>
    %c0 = arith.constant 0 : index
    %c0_0 = arith.constant 0 : index
    %c0_1 = arith.constant 0 : index
    %1 = vector.load %arg2[%c0, %c0_0, %c0_1] : memref<1x16x1xi32, #tpu.memory_space<vmem>>, vector<1x16x1xi32>
    %2 = vector.shape_cast %1 : vector<1x16x1xi32> to vector<16x1xi32>
    %3 = vector.broadcast %2 : vector<16x1xi32> to vector<16x64xi32>
    %4 = arith.cmpi eq, %0, %3 : vector<16x64xi32>
    %5 = arith.extui %4 : vector<16x64xi1> to vector<16x64xi32>
    %6 = arith.sitofp %5 : vector<16x64xi32> to vector<16x64xf32>
    %c0_2 = arith.constant 0 : index
    %c0_3 = arith.constant 0 : index
    %7 = vector.load %arg3[%c0_2, %c0_3] : memref<64x128xf32, #tpu.memory_space<vmem>>, vector<64x128xf32>
    %cst = arith.constant dense<0.000000e+00> : vector<16x128xf32>
    %8 = tpu.matmul %6, %7, %cst {dimension_numbers = #tpu.dot_dimension_numbers<[1], [0], [0], [1], [0, 0, 1, 1], [], []>} : vector<16x64xf32>, vector<64x128xf32>, vector<16x128xf32> -> vector<16x128xf32>
    %c0_4 = arith.constant 0 : index
    %c0_5 = arith.constant 0 : index
    %9 = vector.load %arg4[%c0_4, %c0_5] : memref<16x128xf32, #tpu.memory_space<vmem>>, vector<16x128xf32>
    %10 = arith.addf %8, %9 : vector<16x128xf32>
    %c0_6 = arith.constant 0 : index
    %c0_7 = arith.constant 0 : index
    %c0_8 = arith.constant 0 : index
    %11 = vector.load %arg5[%c0_6, %c0_7, %c0_8] : memref<1x16x1xf32, #tpu.memory_space<vmem>>, vector<1x16x1xf32>
    %12 = vector.shape_cast %11 : vector<1x16x1xf32> to vector<16x1xf32>
    %c0_9 = arith.constant 0 : index
    %c0_10 = arith.constant 0 : index
    %13 = vector.load %arg6[%c0_9, %c0_10] : memref<1x128xf32, #tpu.memory_space<vmem>>, vector<1x128xf32>
    %14 = vector.broadcast %12 : vector<16x1xf32> to vector<16x128xf32>
    %15 = vector.broadcast %13 : vector<1x128xf32> to vector<16x128xf32>
    %16 = arith.mulf %14, %15 : vector<16x128xf32>
    %17 = arith.addf %10, %16 : vector<16x128xf32>
    %c0_11 = arith.constant 0 : index
    %c0_12 = arith.constant 0 : index
    %c0_13 = arith.constant 0 : index
    %18 = vector.load %arg7[%c0_11, %c0_12, %c0_13] : memref<1x16x128xf32, #tpu.memory_space<vmem>>, vector<1x16x128xf32>
    %19 = vector.shape_cast %18 : vector<1x16x128xf32> to vector<16x128xf32>
    %20 = vector.shape_cast %17 : vector<16x128xf32> to vector<1x16x128xf32>
    tpu.vector_store %arg7[%c0_11, %c0_12, %c0_13], %20 {strides = array<i32>} : memref<1x16x128xf32, #tpu.memory_space<vmem>>, vector<1x16x128xf32>,
    return
  }
  func.func @transform_0(%arg0: i32, %arg1: i32) -> (i32, i32, i32) {
    %c0_i32 = arith.constant 0 : i32
    %c0_i32_0 = arith.constant 0 : i32
    return %arg1, %arg0, %c0_i32 : i32, i32, i32
  }
  func.func @transform_1(%arg0: i32, %arg1: i32) -> (i32, i32) {
    %c0_i32 = arith.constant 0 : i32
    %c0_i32_0 = arith.constant 0 : i32
    %c0_i32_1 = arith.constant 0 : i32
    return %c0_i32, %c0_i32_0 : i32, i32
  }
  func.func @transform_2(%arg0: i32, %arg1: i32) -> (i32, i32) {
    %c0_i32 = arith.constant 0 : i32
    %c0_i32_0 = arith.constant 0 : i32
    return %arg0, %c0_i32 : i32, i32
  }
  func.func @transform_3(%arg0: i32, %arg1: i32) -> (i32, i32, i32) {
    %c0_i32 = arith.constant 0 : i32
    %c0_i32_0 = arith.constant 0 : i32
    return %arg1, %arg0, %c0_i32 : i32, i32, i32
  }
  func.func @transform_4(%arg0: i32, %arg1: i32) -> (i32, i32) {
    %c0_i32 = arith.constant 0 : i32
    %c0_i32_0 = arith.constant 0 : i32
    %c0_i32_1 = arith.constant 0 : i32
    return %c0_i32, %c0_i32_0 : i32, i32
  }
  func.func @transform_5(%arg0: i32, %arg1: i32) -> (i32, i32, i32) {
    %c0_i32 = arith.constant 0 : i32
    %c0_i32_0 = arith.constant 0 : i32
    return %arg1, %arg0, %c0_i32 : i32, i32, i32
  }
}

</mosaic_0001>

<bundles_post_ra>
// kernel: tpu_custom_call.1
= control target key start
LH: loop header
LB: loop body
LE: loop exit
PB: predicated region body
PF: predicated region fallthrough
CT: control target
= control target key end

     0   :  { %10 = vsyncpa [#allocation3], 0  ;;  %s914_s0 = inlined_call_operand.vmem [shape: s32[2,16,1], index: 0, kind: input, shape index: {}]   ;;  %s915_s1 = inlined_call_operand.vmem [shape: f32[64,128], index: 1, kind: input, shape index: {}]   ;;  %s916_s2 = inlined_call_operand.hbm [shape: f32[16,128], index: 2, kind: input, shape index: {}]   ;;  %s917_s3 = inlined_call_operand.vmem [shape: f32[2,16,1], index: 3, kind: input, shape index: {}]   ;;  %s918_s4 = inlined_call_operand.vmem [shape: f32[1,128], index: 4, kind: input, shape index: {}]   ;;  %s919_s5 = inlined_call_operand.hbm [shape: f32[2,16,128], index: 5, kind: output, shape index: {}]  }
   0x1   :  { %11 = vsyncpa [#allocation4], 0 }
   0x2   :  { %13 = vsyncpa [#allocation4 + $0x1], 0  ;;  %s781_s18 = smov 0   ;;  %s783_s19 = smov 0  }
   0x3   :  { %s785_s20 = smov 0   ;;  %s787_s21 = smov 0  }
   0x4   :  { %s789_s22 = smov 0   ;;  %s791_s23 = smov 0  }
   0x5 LB: > { %s523_s24 = sadd.s32 4294967295, %s742_s23   ;;  %s524_s25 = sadd.s32 4294967294, %s742_s23   ;;  %s742_s23 = sphi %s791_s23, %s19_s23   ;;  %s738_s22 = sphi %s789_s22, %s926_s22   ;;  %s734_s21 = sphi %s787_s21, %s925_s21   ;;  %s730_s20 = sphi %s785_s20, %s924_s20   ;;  %s726_s19 = sphi %s783_s19, %s923_s19   ;;  %s722_s18 = sphi %s781_s18, %s922_s18  }
   0x6   : > { %s28_s26 = sadd.s32 1, %s738_s22  ;;  %s164_s27 = sadd.s32 1, %s730_s20 }
   0x7   : > { %p29_p0 = scmp.ge.s32.totalorder %s28_s26, 2  ;;  %p174_p1 = scmp.ne.s32.totalorder %s730_s20, %s726_s19 }
   0x8   : > { %p175_p2 = scmp.eq.s32.totalorder %s523_s24, 1  ;;  %p180_p3 = scmp.ne.s32.totalorder %s726_s19, %s722_s18 }
   0x9   : > { %s928_s26 = smov (%p29_p0, %s28_s26), 0  ;;  %p181_p5 = scmp.eq.s32.totalorder %s524_s25, 1 }
   0xa   : > { %p821_p4 = por %p175_p2, %p174_p1  ;;  %s159_s29 = ssub.s32 %s738_s22, %s928_s26 }
   0xb   : > { %p525_p6 = scmp.ge.s32.totalorder %s742_s23, 1  ;;  %p162_p7 = scmp.eq.s32.totalorder %s159_s29, 0 }
   0xc   : > { %p828_p8 = por %p181_p5, %p180_p3  ;;  %p188_p9 = scmp.lt.s32.totalorder %s742_s23, 3 }
   0xd   : > { %s834_s6 = scalar_select %p162_p7, %s730_s20, %s164_s27  }
   0xe   : > { %p189_p10 = pnand %p525_p6, %p188_p9  ;;  %p569_p11 = scmp.eq.s32.totalorder %s523_s24, 0 }
   0xf   : > { %s205_s9 = sshll.u32 %s916_s2, 4  ;;  %s744_s10 = smov [#allocation2]   ;;  %s206_s9 = int_to_ptr.hbm [resolvable:$true] %s205_s9 }
  0x10   : > { %p561_p12 = pneg %p189_p10  ;;  %s207_s11 = sshll.u32 %s744_s10, 4  ;;  %s208_s11 = int_to_ptr.vmem [resolvable:$true] %s207_s11 }
  0x11   : > { %s745_s12 = smov 128   ;;  %s746_s13 = smov 8  }
  0x12   : > { %p562_p13 = pnand %p569_p11, %p561_p12  ;;  %252 = sbr.rel (%p189_p10) target bundleno = 290 (0x122), region = 40 }
  0x14   : > { %564 = dma.hbm_to_vmem [thread:$0]  (!%p562_p13), %s206_s9, 256, %s208_s11, [#allocation3], %s745_s12, %s745_s12, %s746_s13  }
  0x17   : > { %713 = dma.done.wait (%p569_p11), [#allocation3], 256  }
  0x18   : > { %715 = vsyncadd (%p569_p11), [#allocation3], 4294967040  ;;  %p295_p0 = scmp.lt.s32.totalorder %s734_s21, 1  ;;  %v747_v0 = vmov 0   ;;  %v339_v2 = vld [vmem:[%s915_s1 + $0x38] sm:$0xff]  ;;  %v338_v3 = vld [vmem:[%s915_s1 + $0x30] sm:$0xff]  ;;  %v316_v13 = vlaneseq }
  0x19   : > { %627 = vset.pattern.permute.xlu0 %v747_v0  ;;  %628 = vset.pattern.permute.xlu1 %v747_v0  ;;  %v337_v4 = vld [vmem:[%s915_s1 + $0x28] sm:$0xff]  ;;  %v336_v5 = vld [vmem:[%s915_s1 + $0x20] sm:$0xff]  ;;  %v335_v7 = vld [vmem:[%s915_s1 + $0x18] sm:$0xff]  ;;  %vm342_vm0 = vcmask 523264   ;;  %v748_v16 = vmov 0.0   ;;  %s291_s10 = sand.u32 1, %s726_s19  }
  0x1a   : > { %s841_s14 = scalar_select %p295_p0, %s734_s21, 1  ;;  %357 = vmatpush.msra.mxu0 %v339_v2  ;;  %547 = vmatpush.msra.mxu1 %v339_v2  ;;  %v334_v8 = vld [vmem:[%s915_s1 + $0x10] sm:$0xff]  ;;  %v333_v9 = vld [vmem:[%s915_s1 + $0x8] sm:$0xff]  ;;  %v332_v10 = vld [vmem:[%s915_s1] sm:$0xff]  ;;  %v317_v14 = vand.u32 127, %v316_v13 }
  0x1b   : > { %v629_v20 = vld [vmem:[%s918_s4] ss:$0 sm:$0xff]  ;;  %s530_s11 = sshll.u32 %s291_s10, 4  ;;  %s546_s12 = sshll.u32 %s734_s21, 4  ;;  %v341_v28 = vld [vmem:[#allocation2 + $0x8] sm:$0xff] }
  0x1c   : > { %s544_s15 = sshll.u32 %s841_s14, 4  ;;  %358 = vmatpush.msra.mxu0 %v338_v3  ;;  %548 = vmatpush.msra.mxu1 %v338_v3  ;;  %v340_v22 = vld [vmem:[#allocation2] sm:$0xff]  ;;  %s408_s16 = scalar_lea.hbm %s919_s5, %s546_s12 }
  0x1d   : > { %s302_s24 = scalar_lea.vmem %s914_s0, %s544_s15  ;;  %s313_s29 = scalar_lea.vmem %s917_s3, %s544_s15 }
  0x1e   : > { %v318_v1 = vld [vmem:[%s302_s24] sm:$0xff]  ;;  %359 = vmatpush.msra.mxu0 %v337_v4  ;;  %v319_v6 = vld [vmem:[%s302_s24 + $0x8] sm:$0xff]  ;;  %549 = vmatpush.msra.mxu1 %v337_v4  ;;  %s293_s17 = scalar_lea.vmem [#allocation5], %s530_s11  ;;  %s411_s24 = sshll.u32 %s408_s16, 4  ;;  %s412_s24 = int_to_ptr.hbm [resolvable:$true] %s411_s24 }
  0x1f   : > { %321 = vperm.xlu0 %627, %v318_v1   ;;  %v372_v11 = vld [vmem:[%s313_s29] sm:$0xff]  ;;  %v373_v12 = vld [vmem:[%s313_s29 + $0x8] sm:$0xff]  ;;  %s409_s25 = sshll.u32 %s293_s17, 4  ;;  %s395_s21 = scalar_lea.sflag [#allocation4], %s291_s10  ;;  %s410_s25 = int_to_ptr.vmem [resolvable:$true] %s409_s25 }
  0x20   : > { %360 = vmatpush.msra.mxu0 %v336_v5  ;;  %550 = vmatpush.msra.mxu1 %v336_v5  ;;  %s674_s27 = sshra.s32 %s412_s24, 4  ;;  %s680_s15 = scalar_lea.hbm %s919_s5, 32  ;;  %s675_s27 = int_to_ptr.hbm [resolvable:$true] %s674_s27 }
  0x21   : > { %377 = vperm.xlu1 %628, %v372_v11   ;;  %s676_s29 = scalar_lea.hbm %s675_s27, 16  ;;  %p681_p5 = scmp.lt.s32.totalorder %s675_s27, %s919_s5 }
  0x22   : > { %361 = vmatpush.msra.mxu0 %v335_v7  ;;  %551 = vmatpush.msra.mxu1 %v335_v7  ;;  %p677_p1 = scmp.ne.s32.totalorder %s675_s27, %s676_s29  ;;  %p682_p6 = scmp.lt.s32.totalorder %s680_s15, %s676_s29 }
  0x24   : > { %362 = vmatpush.msra.mxu0 %v334_v8  ;;  %552 = vmatpush.msra.mxu1 %v334_v8  ;;  %p678_p2 = pnand %p677_p1, %p821_p4  ;;  %p683_p7 = por %p682_p6, %p681_p5 }
  0x26   : > { %363 = vmatpush.msra.mxu0 %v333_v9  ;;  %553 = vmatpush.msra.mxu1 %v333_v9  ;;  %p679_p3 = pneg %p678_p2 }
  0x27   : > { %324 = vperm.xlu0 %627, %v319_v6  }
  0x28   : > { %364 = vmatpush.msra.mxu0 %v332_v10  ;;  %554 = vmatpush.msra.mxu1 %v332_v10  ;;  %p684_p9 = pnand %p683_p7, %p679_p3 }
  0x29   : > { %382 = vperm.xlu1 %628, %v373_v12  }
  0x91   : > { %v322_v15 = vpop.permute.xlu0 %321 }
  0x92   : > { %vm326_vm1 = vcmp.eq.s32.totalorder %v317_v14, %v322_v15 }
  0x93   : > { %v535_v17 = vsel %vm326_vm1, 1.0, %v748_v16  ;;  %v378_v21 = vpop.permute.xlu1 %377 }
  0x94   : > { %537 = vmatmul.msk.f32.vlgmr.msra.gmra.mxu0 %vm342_vm0, %v535_v17  ;;  %v388_v23 = vmul.f32 %v629_v20, %v378_v21 }
  0x99   : > { %v325_v18 = vpop.permute.xlu0 %324 }
  0x9a   : > { %vm327_vm2 = vcmp.eq.s32.totalorder %v317_v14, %v325_v18 }
  0x9b   : > { %v536_v19 = vsel %vm327_vm2, 1.0, %v748_v16  ;;  %v383_v27 = vpop.permute.xlu1 %382 }
  0x9c   : > { %538 = vmatmul.msk.f32.vlgmr.msra.gmra.mxu1 %vm342_vm0, %v536_v19  ;;  %v389_v30 = vmul.f32 %v629_v20, %v383_v27 }
 0x111   : > { %v366_v24 = vpop.f32.mrf.mxu0 }
 0x112   : > { %v367_v25 = vadd.f32 %v366_v24, %v340_v22 }
 0x114   : > { %v390_v26 = vadd.f32 %v388_v23, %v367_v25 }
 0x116   : > { %392 = vst [vmem:[%s293_s17] sm:$0xff] %v390_v26 }
 0x119   : > { %v369_v29 = vpop.f32.mrf.mxu1 }
 0x11a   : > { %v370_v31 = vadd.f32 %v369_v29, %v341_v28 }
 0x11c   : > { %v391_v32 = vadd.f32 %v389_v30, %v370_v31 }
 0x11e   : > { %393 = vst [vmem:[%s293_s17 + $0x8] sm:$0xff] %v391_v32 }
 0x11f   : > { %687 = shalt.err (!%p684_p9)
}
 0x120   : > { %s749_s10 = smov 128   ;;  %s750_s12 = smov 8  }
 0x121   : > { %559 = dma.vmem_to_hbm [thread:$0]  (%p821_p4), %s410_s25, 256, %s412_s24, %s395_s21, %s749_s10, %s749_s10, %s750_s12  }
 0x122 PF: > { %p571_p10 = scmp.ge.s32.totalorder %s742_s23, 2  ;;  %s426_s13 = sand.u32 1, %s722_s18  }
 0x123   : > { %s427_s14 = scalar_lea.sflag [#allocation4], %s426_s13 }
 0x124   : > { %p566_p11 = pnand %p571_p10, %p828_p8 }
 0x126   : > { %p567_p12 = pneg %p566_p11 }
 0x128   : > { %717 = dma.done.wait (%p567_p12), %s427_s14, 256  }
 0x129   : > { %719 = vsyncadd (%p567_p12), %s427_s14, 4294967040  ;;  %s19_s23 = sadd.s32 1, %s742_s23   ;;  %s922_s18 = smov %s726_s19 }
 0x12a   : > { %p16_p13 = scmp.ge.s32.totalorder %s19_s23, 4   ;;  %s923_s19 = smov %s730_s20 }
 0x12b   : > { %s924_s20 = smov %s834_s6  ;;  %s925_s21 = smov %s738_s22 }
 0x12c   : > { %s926_s22 = smov %s928_s26  ;;  %18 = sbr.rel (!%p16_p13) target bundleno = 5 (0x5), region = 84 }
 0x131   :  { %433 = vsyncpa [#allocation3], 1 }
 0x132   :  { %435 = vsyncpa [#allocation3 + $0x1], 1 }
 0x133   :  { %436 = vsyncpa [#allocation4], 1 }
 0x134   :  { %438 = vsyncpa [#allocation4 + $0x1], 1 }

</bundles_post_ra>
